<compile_context>
chip_gen: v6e
topology: v6e:2x2x1
jax: 0.10.0
libtpu: 0.0.40
codegen_flags: <defaults>
</compile_context>

<pallas_src>
import jax
import jax.numpy as jnp
from jax.experimental import pallas as pl
from jax.experimental.pallas import tpu as pltpu

H1 = 128       # fc1 width (already lane-aligned)
H2 = 64        # fc2 width in the PyTorch module
H2_PAD = 128   # fc2 width padded to a full vreg lane width


def _round_up(x, m):
    return (x + m - 1) // m * m


def qnet_kernel(x_ref, w1_ref, b1_ref, w2_ref, b2_ref, w3_ref, b3_ref, o_ref):
    # fc1: MXU (bf16 in, f32 accumulate); bias + ReLU in f32.
    h1 = jnp.dot(x_ref[...], w1_ref[...], preferred_element_type=jnp.float32)
    h1 = jnp.maximum(h1 + b1_ref[...], 0.0)

    # fc2: output padded 64 -> 128 with zero weights/biases (ReLU keeps them 0).
    h2 = jnp.dot(h1.astype(jnp.bfloat16), w2_ref[...],
                 preferred_element_type=jnp.float32)
    h2 = jnp.maximum(h2 + b2_ref[...], 0.0)

    # logits (128 -> 1): an N=1 MXU matmul wastes the array; do VPU mul + lane reduce.
    q = jnp.sum(h2 * w3_ref[...], axis=-1, keepdims=True) + b3_ref[0]
    o_ref[...] = q.astype(o_ref.dtype)


def qnetwork_forward(x, params, *, tile_b=1024):
    """x: (B, input_size) float -> (B, 1) float32."""
    w1, b1, w2, b2, w3_row, b3 = params
    B, D = x.shape

    # Batch tile: multiple of 16 (bf16 sublane packing), capped near B for tiny batches.
    tile_b = max(16, min(tile_b, _round_up(B, 16)))
    b_pad = _round_up(B, tile_b)

    x = x.astype(jnp.bfloat16)           # halves streamed HBM bytes for x
    if b_pad != B:
        x = jnp.pad(x, ((0, b_pad - B), (0, 0)))

    grid = (b_pad // tile_b,)

    def resident(shape):
        # Constant block index -> stays VMEM-resident across all grid steps.
        return pl.BlockSpec(shape, lambda i: (0,) * len(shape))

    out = pl.pallas_call(
        qnet_kernel,
        out_shape=jax.ShapeDtypeStruct((b_pad, 1), jnp.float32),
        grid_spec=pltpu.PrefetchScalarGridSpec(
            num_scalar_prefetch=0,
            grid=grid,
            in_specs=[
                pl.BlockSpec((tile_b, D), lambda i: (i, 0)),        # x (streamed)
                resident(w1.shape),                                 # (D, 128) bf16
                resident(b1.shape),                                 # (1, 128) f32
                resident(w2.shape),                                 # (128, 128) bf16
                resident(b2.shape),                                 # (1, 128) f32
                resident(w3_row.shape),                             # (1, 128) f32
                pl.BlockSpec(memory_space=pltpu.MemorySpace.SMEM),  # b3 scalar
            ],
            out_specs=pl.BlockSpec((tile_b, 1), lambda i: (i, 0)),
        ),
        compiler_params=pltpu.CompilerParams(
            dimension_semantics=("parallel",),
        ),
    )(x, w1, b1, w2, b2, w3_row, b3)

    return out[:B]


def init_params(key, input_size, h1=H1, h2=H2):
    """f32 params mirroring nn.Linear default init, already in (in, out) layout."""
    ks = jax.random.split(key, 6)

    def lin(kw, kb, fan_in, fan_out):
        bound = 1.0 / jnp.sqrt(jnp.float32(fan_in))
        w = jax.random.uniform(kw, (fan_in, fan_out), jnp.float32, -bound, bound)
        b = jax.random.uniform(kb, (fan_out,), jnp.float32, -bound, bound)
        return w, b

    w1, b1 = lin(ks[0], ks[1], input_size, h1)
    w2, b2 = lin(ks[2], ks[3], h1, h2)
    w3, b3 = lin(ks[4], ks[5], h2, 1)
    return (w1, b1, w2, b2, w3, b3)


def prepare_params(raw_params):
    """Kernel-ready params: bf16 MXU weights, 64->128 zero padding,
    w3 as a (1, 128) lane row, b3 as a scalar for SMEM."""
    w1, b1, w2, b2, w3, b3 = raw_params
    h2 = w2.shape[1]
    pad = H2_PAD - h2

    w1k = w1.astype(jnp.bfloat16)                                          # (D, 128)
    b1k = b1.reshape(1, -1).astype(jnp.float32)                            # (1, 128)
    w2k = jnp.pad(w2, ((0, 0), (0, pad))).astype(jnp.bfloat16)             # (128, 128)
    b2k = jnp.pad(b2, (0, pad)).reshape(1, -1).astype(jnp.float32)         # (1, 128)
    w3k = jnp.pad(w3.reshape(1, -1), ((0, 0), (0, pad))).astype(jnp.float32)  # (1, 128)
    b3k = b3.reshape(1).astype(jnp.float32)                                # (1,)
    return (w1k, b1k, w2k, b2k, w3k, b3k)


def reference_forward(x, raw_params):
    w1, b1, w2, b2, w3, b3 = raw_params
    h1 = jnp.maximum(x @ w1 + b1, 0.0)
    h2 = jnp.maximum(h1 @ w2 + b2, 0.0)
    return h2 @ w3 + b3


if __name__ == "__main__":
    key = jax.random.PRNGKey(0)
    k_x, k_p, k_x2 = jax.random.split(key, 3)

    input_size = 32
    raw = init_params(k_p, input_size)
    params = prepare_params(raw)

    # Small single-tile case (typical RL inference batch).
    x_small = jax.random.normal(k_x, (8, input_size), jnp.float32)
    out_small = jax.block_until_ready(qnetwork_forward(x_small, params))
    ref_small = reference_forward(x_small, raw)
    assert out_small.shape == (8, 1)
    assert jnp.allclose(out_small, ref_small, atol=5e-2, rtol=5e-2), "mismatch (small)"

    # Multi-tile case exercising the batch grid + padding path.
    x_big = jax.random.normal(k_x2, (300, input_size), jnp.float32)
    out_big = jax.block_until_ready(qnetwork_forward(x_big, params, tile_b=128))
    ref_big = reference_forward(x_big, raw)
    assert out_big.shape == (300, 1)
    assert jnp.allclose(out_big, ref_big, atol=5e-2, rtol=5e-2), "mismatch (big)"

    print("KERNEL_OK")
</pallas_src>

<mosaic_0001>
module attributes {stable_mosaic.version = 11 : i64} {
  func.func @qnet_kernel(%arg0: i32, %arg1: memref<16x32xbf16, #tpu.memory_space<vmem>>, %arg2: memref<32x128xbf16, #tpu.memory_space<vmem>>, %arg3: memref<1x128xf32, #tpu.memory_space<vmem>>, %arg4: memref<128x128xbf16, #tpu.memory_space<vmem>>, %arg5: memref<1x128xf32, #tpu.memory_space<vmem>>, %arg6: memref<1x128xf32, #tpu.memory_space<vmem>>, %arg7: memref<1xf32, #tpu.memory_space<smem>>, %arg8: memref<16x1xf32, #tpu.memory_space<vmem>>) attributes {dimension_semantics = [#tpu.dimension_semantics<parallel>], iteration_bounds = array<i64: 1>, scalar_prefetch = 0 : i64, scratch_operands = 0 : i64, tpu.core_type = #tpu.core_type<tc>, window_params = [{transform_indices = @transform_0, window_bounds = array<i64: 16, 32>}, {pipeline_mode = #tpu.pipeline_mode<synchronous>, transform_indices = @transform_1, window_bounds = array<i64: 32, 128>}, {pipeline_mode = #tpu.pipeline_mode<synchronous>, transform_indices = @transform_2, window_bounds = array<i64: 1, 128>}, {pipeline_mode = #tpu.pipeline_mode<synchronous>, transform_indices = @transform_3, window_bounds = array<i64: 128, 128>}, {pipeline_mode = #tpu.pipeline_mode<synchronous>, transform_indices = @transform_4, window_bounds = array<i64: 1, 128>}, {pipeline_mode = #tpu.pipeline_mode<synchronous>, transform_indices = @transform_5, window_bounds = array<i64: 1, 128>}, {transform_indices = @transform_6, window_bounds = array<i64: 1>}, {transform_indices = @transform_7, window_bounds = array<i64: 16, 1>}]} {
    %c0 = arith.constant 0 : index
    %c0_0 = arith.constant 0 : index
    %0 = vector.load %arg1[%c0, %c0_0] : memref<16x32xbf16, #tpu.memory_space<vmem>>, vector<16x32xbf16>
    %c0_1 = arith.constant 0 : index
    %c0_2 = arith.constant 0 : index
    %1 = vector.load %arg2[%c0_1, %c0_2] : memref<32x128xbf16, #tpu.memory_space<vmem>>, vector<32x128xbf16>
    %cst = arith.constant dense<0.000000e+00> : vector<16x128xf32>
    %2 = tpu.matmul %0, %1, %cst {dimension_numbers = #tpu.dot_dimension_numbers<[1], [0], [0], [1], [0, 0, 1, 1], [], []>} : vector<16x32xbf16>, vector<32x128xbf16>, vector<16x128xf32> -> vector<16x128xf32>
    %c0_3 = arith.constant 0 : index
    %c0_4 = arith.constant 0 : index
    %3 = vector.load %arg3[%c0_3, %c0_4] : memref<1x128xf32, #tpu.memory_space<vmem>>, vector<1x128xf32>
    %4 = vector.broadcast %3 : vector<1x128xf32> to vector<16x128xf32>
    %5 = arith.addf %2, %4 : vector<16x128xf32>
    %cst_5 = arith.constant 0.000000e+00 : f32
    %6 = vector.broadcast %cst_5 : f32 to vector<16x128xf32>
    %7 = arith.maximumf %5, %6 : vector<16x128xf32>
    %8 = arith.truncf %7 : vector<16x128xf32> to vector<16x128xbf16>
    %c0_6 = arith.constant 0 : index
    %c0_7 = arith.constant 0 : index
    %9 = vector.load %arg4[%c0_6, %c0_7] : memref<128x128xbf16, #tpu.memory_space<vmem>>, vector<128x128xbf16>
    %cst_8 = arith.constant dense<0.000000e+00> : vector<16x128xf32>
    %10 = tpu.matmul %8, %9, %cst_8 {dimension_numbers = #tpu.dot_dimension_numbers<[1], [0], [0], [1], [0, 0, 1, 1], [], []>} : vector<16x128xbf16>, vector<128x128xbf16>, vector<16x128xf32> -> vector<16x128xf32>
    %c0_9 = arith.constant 0 : index
    %c0_10 = arith.constant 0 : index
    %11 = vector.load %arg5[%c0_9, %c0_10] : memref<1x128xf32, #tpu.memory_space<vmem>>, vector<1x128xf32>
    %12 = vector.broadcast %11 : vector<1x128xf32> to vector<16x128xf32>
    %13 = arith.addf %10, %12 : vector<16x128xf32>
    %cst_11 = arith.constant 0.000000e+00 : f32
    %14 = vector.broadcast %cst_11 : f32 to vector<16x128xf32>
    %15 = arith.maximumf %13, %14 : vector<16x128xf32>
    %c0_12 = arith.constant 0 : index
    %c0_13 = arith.constant 0 : index
    %16 = vector.load %arg6[%c0_12, %c0_13] : memref<1x128xf32, #tpu.memory_space<vmem>>, vector<1x128xf32>
    %17 = vector.broadcast %16 : vector<1x128xf32> to vector<16x128xf32>
    %18 = arith.mulf %15, %17 : vector<16x128xf32>
    %cst_14 = arith.constant dense<0.000000e+00> : vector<16xf32>
    %19 = vector.multi_reduction <add>, %18, %cst_14 [1] : vector<16x128xf32> to vector<16xf32>
    %20 = vector.shape_cast %19 : vector<16xf32> to vector<16x1xf32>
    %c0_15 = arith.constant 0 : index
    %21 = memref.load %arg7[%c0_15] : memref<1xf32, #tpu.memory_space<smem>>
    %22 = vector.broadcast %21 : f32 to vector<16x1xf32>
    %23 = arith.addf %20, %22 : vector<16x1xf32>
    %c0_16 = arith.constant 0 : index
    %c0_17 = arith.constant 0 : index
    %24 = vector.load %arg8[%c0_16, %c0_17] : memref<16x1xf32, #tpu.memory_space<vmem>>, vector<16x1xf32>
    tpu.vector_store %arg8[%c0_16, %c0_17], %23 {strides = array<i32>} : memref<16x1xf32, #tpu.memory_space<vmem>>, vector<16x1xf32>,
    return
  }
  func.func @transform_0(%arg0: i32) -> (i32, i32) {
    %c0_i32 = arith.constant 0 : i32
    %c0_i32_0 = arith.constant 0 : i32
    return %arg0, %c0_i32 : i32, i32
  }
  func.func @transform_1(%arg0: i32) -> (i32, i32) {
    %c0_i32 = arith.constant 0 : i32
    %c0_i32_0 = arith.constant 0 : i32
    %c0_i32_1 = arith.constant 0 : i32
    return %c0_i32, %c0_i32_0 : i32, i32
  }
  func.func @transform_2(%arg0: i32) -> (i32, i32) {
    %c0_i32 = arith.constant 0 : i32
    %c0_i32_0 = arith.constant 0 : i32
    %c0_i32_1 = arith.constant 0 : i32
    return %c0_i32, %c0_i32_0 : i32, i32
  }
  func.func @transform_3(%arg0: i32) -> (i32, i32) {
    %c0_i32 = arith.constant 0 : i32
    %c0_i32_0 = arith.constant 0 : i32
    %c0_i32_1 = arith.constant 0 : i32
    return %c0_i32, %c0_i32_0 : i32, i32
  }
  func.func @transform_4(%arg0: i32) -> (i32, i32) {
    %c0_i32 = arith.constant 0 : i32
    %c0_i32_0 = arith.constant 0 : i32
    %c0_i32_1 = arith.constant 0 : i32
    return %c0_i32, %c0_i32_0 : i32, i32
  }
  func.func @transform_5(%arg0: i32) -> (i32, i32) {
    %c0_i32 = arith.constant 0 : i32
    %c0_i32_0 = arith.constant 0 : i32
    %c0_i32_1 = arith.constant 0 : i32
    return %c0_i32, %c0_i32_0 : i32, i32
  }
  func.func @transform_6(%arg0: i32) -> i32 {
    %c0_i32 = arith.constant 0 : i32
    %c0_i32_0 = arith.constant 0 : i32
    return %c0_i32 : i32
  }
  func.func @transform_7(%arg0: i32) -> (i32, i32) {
    %c0_i32 = arith.constant 0 : i32
    %c0_i32_0 = arith.constant 0 : i32
    return %arg0, %c0_i32 : i32, i32
  }
}

</mosaic_0001>

<bundles_post_ra>
// kernel: tpu_custom_call.1
= control target key start
LH: loop header
LB: loop body
LE: loop exit
PB: predicated region body
PF: predicated region fallthrough
CT: control target
= control target key end

     0   :  { %13 = vsyncpa [#allocation4], 0  ;;  %s498_s0 = inlined_call_operand.hbm [shape: bf16[16,32], index: 0, kind: input, shape index: {}]   ;;  %s499_s1 = inlined_call_operand.hbm [shape: bf16[32,128], index: 1, kind: input, shape index: {}]   ;;  %s500_s2 = inlined_call_operand.vmem [shape: f32[1,128], index: 2, kind: input, shape index: {}]   ;;  %s501_s3 = inlined_call_operand.hbm [shape: bf16[128,128], index: 3, kind: input, shape index: {}]   ;;  %s502_s4 = inlined_call_operand.vmem [shape: f32[1,128], index: 4, kind: input, shape index: {}]   ;;  %s503_s5 = inlined_call_operand.vmem [shape: f32[1,128], index: 5, kind: input, shape index: {}]   ;;  %s504_s6 = inlined_call_operand.<no memory space> [shape: f32[1], index: 6, kind: input, shape index: {}]   ;;  %s505_s7 = inlined_call_operand.vmem [shape: f32[16,1], index: 7, kind: output, shape index: {}]  }
   0x1   :  { %14 = vsyncpa [#allocation6], 0  ;;  %s424_s24 = smov [#allocation5]   ;;  %s425_s26 = smov [#allocation3]  }
   0x2   :  { %s32_s25 = sshll.u32 %s424_s24, 4  ;;  %s20_s27 = sshll.u32 %s425_s26, 4  ;;  %s33_s25 = int_to_ptr.vmem [resolvable:$true] %s32_s25  ;;  %s21_s27 = int_to_ptr.vmem [resolvable:$true] %s20_s27 }
   0x3   :  { %s368_s28 = scalar_lea.vmem %s33_s25, 256  ;;  %p373_p1 = scmp.lt.s32.totalorder %s33_s25, %s33_s25 }
   0x4   :  { %p369_p0 = scmp.ne.s32.totalorder %s33_s25, %s368_s28  ;;  %p374_p2 = scmp.lt.s32.totalorder %s368_s28, %s368_s28 }
   0x6   :  { %p375_p3 = por %p374_p2, %p373_p1 }
   0x8   :  { %p376_p4 = pnand %p375_p3, %p369_p0 }
   0xa   :  { %379 = shalt.err (!%p376_p4)
}
   0xb   :  { %s426_s29 = smov 64   ;;  %s427_s30 = smov 4  }
   0xc   :  { %38 = dma.hbm_to_vmem [thread:$0]  %s499_s1, 256, %s33_s25, [#allocation6], %s426_s29, %s426_s29, %s427_s30  }
   0xd   :  { %s388_s10 = scalar_lea.vmem %s21_s27, 128  ;;  %p393_p6 = scmp.lt.s32.totalorder %s21_s27, %s21_s27 }
   0xe   :  { %p389_p5 = scmp.ne.s32.totalorder %s21_s27, %s388_s10  ;;  %p394_p7 = scmp.lt.s32.totalorder %s388_s10, %s388_s10 }
  0x10   :  { %p395_p8 = por %p394_p7, %p393_p6 }
  0x12   :  { %p396_p9 = pnand %p395_p8, %p389_p5 }
  0x14   :  { %399 = shalt.err (!%p396_p9)
}
  0x15   :  { %26 = dma.hbm_to_vmem [thread:$0]  %s498_s0, 128, %s21_s27, [#allocation4], %s426_s29, %s426_s29, %s427_s30  }
  0x16   :  { %s428_s13 = smov [#allocation7]  }
  0x17   :  { %s46_s14 = sshll.u32 %s428_s13, 4  ;;  %s47_s14 = int_to_ptr.vmem [resolvable:$true] %s46_s14 }
  0x18   :  { %s408_s15 = scalar_lea.vmem %s47_s14, 1024  ;;  %p413_p11 = scmp.lt.s32.totalorder %s47_s14, %s47_s14 }
  0x19   :  { %p409_p10 = scmp.ne.s32.totalorder %s47_s14, %s408_s15  ;;  %p414_p12 = scmp.lt.s32.totalorder %s408_s15, %s408_s15 }
  0x1b   :  { %p415_p13 = por %p414_p12, %p413_p11 }
  0x1d   :  { %p416_p0 = pnand %p415_p13, %p409_p10 }
  0x1f   :  { %419 = shalt.err (!%p416_p0)
}
  0x20   :  { %52 = dma.hbm_to_vmem [thread:$0]  %s501_s3, 1024, %s47_s14, [#allocation6], %s426_s29, %s426_s29, %s427_s30  }
  0x21   :  { %420 = dma.done.wait [#allocation4], 128  }
  0x22   :  { %421 = vsyncadd [#allocation4], 4294967168 }
  0x23   :  { %422 = dma.done.wait [#allocation6], 1280  }
  0x24   :  { %423 = vsyncadd [#allocation6], 4294966016  ;;  %v429_v0 = vmov 0.0   ;;  %vm430_vm0 = vmmov 0   ;;  %v349_v1 = vld [vmem:[#allocation5 + $0x8] sm:$0xff]   ;;  %v350_v2 = vld [vmem:[#allocation5] sm:$0xff]   ;;  %v275_v34 = vstv %s504_s6 }
  0x25   :  { %314 = vmatprep.subr.bf16.mxu0 %v429_v0  ;;  %318 = vmatprep.mubr.msk.bf16.mxu0 %vm430_vm0, %v429_v0  ;;  %v352_v3 = vld [vmem:[#allocation7 + $0x38] sm:$0xff]   ;;  %v351_v4 = vld [vmem:[#allocation3] sm:$0xff]   ;;  %v353_v5 = vld [vmem:[#allocation7 + $0x30] sm:$0xff]   ;;  %vm99_vm1 = vcmask 261120   ;;  %vm278_vm2 = vcmask 7168  }
  0x26   :  { %322 = vmatprep.subr.bf16.mxu1 %v429_v0  ;;  %338 = vmatprep.mubr.msk.bf16.mxu1 %vm430_vm0, %v429_v0  ;;  %v354_v6 = vld [vmem:[#allocation7 + $0x28] sm:$0xff]   ;;  %v355_v7 = vld [vmem:[#allocation7 + $0x20] sm:$0xff]   ;;  %v356_v8 = vld [vmem:[#allocation7 + $0x18] sm:$0xff]  }
  0x27   :  { %315 = vmatpush3.bf16.msra.mxu0 %v349_v1  ;;  %323 = vmatpush3.bf16.msra.mxu1 %v352_v3  ;;  %v357_v9 = vld [vmem:[#allocation7 + $0x10] sm:$0xff]   ;;  %v358_v10 = vld [vmem:[#allocation7 + $0x8] sm:$0xff]   ;;  %v359_v11 = vld [vmem:[#allocation7] sm:$0xff]  }
  0x28   :  { %316 = vmatprep.subr.bf16.mxu0 %v429_v0  ;;  %324 = vmatprep.subr.bf16.mxu1 %v429_v0  ;;  %v287_v12 = vld [vmem:[%s500_s2] ss:$0 sm:$0xff] }
  0x29   :  { %v292_v22 = vld [vmem:[%s502_s4] ss:$0 sm:$0xff] }
  0x2a   :  { %v301_v26 = vld [vmem:[%s503_s5] ss:$0 sm:$0xff] }
  0x2b   :  { %317 = vmatpush3.bf16.msra.mxu0 %v350_v2  ;;  %325 = vmatpush3.bf16.msra.mxu1 %v353_v5 }
  0x2c   :  { %326 = vmatprep.subr.bf16.mxu1 %v429_v0 }
  0x2e   :  { %319 = vmatmul.mubr.msk.bf16.vlgmr.msra.gmra.mxu0 %vm99_vm1, %v351_v4 }
  0x2f   :  { %327 = vmatpush3.bf16.msra.mxu1 %v354_v6 }
  0x30   :  { %328 = vmatprep.subr.bf16.mxu1 %v429_v0 }
  0x33   :  { %329 = vmatpush3.bf16.msra.mxu1 %v355_v7 }
  0x34   :  { %330 = vmatprep.subr.bf16.mxu1 %v429_v0 }
  0x37   :  { %331 = vmatpush3.bf16.msra.mxu1 %v356_v8 }
  0x38   :  { %332 = vmatprep.subr.bf16.mxu1 %v429_v0 }
  0x3b   :  { %333 = vmatpush3.bf16.msra.mxu1 %v357_v9 }
  0x3c   :  { %334 = vmatprep.subr.bf16.mxu1 %v429_v0 }
  0x3f   :  { %335 = vmatpush3.bf16.msra.mxu1 %v358_v10 }
  0x40   :  { %336 = vmatprep.subr.bf16.mxu1 %v429_v0 }
  0x43   :  { %337 = vmatpush3.bf16.msra.mxu1 %v359_v11 }
  0xee   :  { %v137_v13 = vpop.f32.mrf.mxu0 }
  0xef   :  { %v138_v15 = vadd.f32 %v287_v12, %v137_v13 }
  0xf0   :  { %v320_v14 = vpop.f32.mrf.mxu0 }
  0xf1   :  { %v144_v19 = vmax.f32 %v138_v15, 0.0 }
  0xf2   :  { %v140_v16 = vpop.f32.mrf.mxu0 }
  0xf3   :  { %v141_v17 = vadd.f32 %v287_v12, %v140_v16 }
  0xf4   :  { %v321_v18 = vpop.f32.mrf.mxu0 }
  0xf5   :  { %v145_v20 = vmax.f32 %v141_v17, 0.0 }
  0xf7   :  { %v146_v21 = vpack.c.bf16 %v145_v20, %v144_v19 }
  0xf9   :  { %339 = vmatmul.mubr.bf16.vlgmr.msra.gmra.mxu1 %v146_v21 }
 0x1b9   :  { %v252_v23 = vpop.f32.mrf.mxu1 }
 0x1ba   :  { %v253_v24 = vadd.f32 %v292_v22, %v252_v23 }
 0x1bb   :  { %v340_v25 = vpop.f32.mrf.mxu1 }
 0x1bc   :  { %v259_v27 = vmax.f32 %v253_v24, 0.0 }
 0x1bd   :  { %v255_v28 = vpop.f32.mrf.mxu1 }
 0x1be   :  { %v256_v29 = vadd.f32 %v292_v22, %v255_v28  ;;  %v268_v30 = vmul.f32 %v301_v26, %v259_v27 }
 0x1bf   :  { %v341_v31 = vpop.f32.mrf.mxu1 }
 0x1c0   :  { %v260_v32 = vmax.f32 %v256_v29, 0.0  ;;  %270 = vadd.xlane.f32.xlu0 %v268_v30 }
 0x1c2   :  { %v269_v33 = vmul.f32 %v301_v26, %v260_v32 }
 0x1c4   :  { %272 = vadd.xlane.f32.xlu0 %v269_v33 }
 0x249   :  { %v271_v35 = vpop.xlane.xlu0 %270 }
 0x24a   :  { %v276_v36 = vadd.f32 %v275_v34, %v271_v35 }
 0x24c   :  { %279 = vst.msk [vmem:[%s505_s7] sm:$0xff] %vm278_vm2, %v276_v36 }
 0x24d   :  { %v273_v37 = vpop.xlane.xlu0 %272 }
 0x24e   :  { %v277_v38 = vadd.f32 %v275_v34, %v273_v37 }
 0x250   :  { %280 = vst.msk [vmem:[%s505_s7 + $0x8] sm:$0xff] %vm278_vm2, %v277_v38 }
 0x251   :  { %285 = vsyncpa [#allocation4], 1 }
 0x252   :  { %286 = vsyncpa [#allocation6], 1 }

</bundles_post_ra>
